<compile_context>
chip_gen: v7x
topology: tpu7x:2x2x1
jax: 0.10.0
libtpu: 0.0.40
codegen_flags: <defaults>
</compile_context>

<pallas_src>
import jax
import jax.numpy as jnp
from jax.experimental import pallas as pl
from jax.experimental.pallas import tpu as pltpu

_FEAT_IN, _FEAT_HID, _FEAT_OUT = 4, 4, 2
_LANES = 128
_SAMPLES_PER_ROW = _LANES // _FEAT_IN            # 32 samples per 128-lane row
_OUT_COLS = _SAMPLES_PER_ROW * _FEAT_OUT         # 64 output lanes per row
_TR_MAX = 4096                                   # rows (sublanes) per grid step
_MIN_TILES = 4                                   # aim for >=4 tiles (v7x megacore)


def _round_up(a, b):
    return (a + b - 1) // b * b


def _mlp_kernel(m1_ref, b1_ref, m2_ref, b2_ref, x_ref, o_ref):
    # x_ref: (TR, 128) f32, row-major samples: lane 4g+i = x[sample g, feature i].
    # m1_ref: (128,128) = kron(I32, W1^T)   -> lane 4g+j = pre-act of hidden j.
    # m2_ref: (128, 64) = kron(I32, W2^T)   -> lane 2g+k = output k (compacted).
    hp = jax.lax.Precision.HIGHEST           # fp32 MXU contraction (match f32 ref)
    x = x_ref[...]
    h = jnp.dot(x, m1_ref[...], preferred_element_type=jnp.float32, precision=hp)
    h = jnp.maximum(h + b1_ref[...], 0.0)
    y = jnp.dot(h, m2_ref[...], preferred_element_type=jnp.float32, precision=hp)
    o_ref[...] = y + b2_ref[...]             # single lane-dense store, no concat


def mein_netz_forward(x, w1, b1, w2, b2):
    """x: (B,4); w1: (4,4) [out,in]; b1: (4,); w2: (2,4) [out,in]; b2: (2,).
    Returns (B,2) = lin2(relu(lin1(x))), matching the PyTorch module."""
    B, f_in = x.shape
    assert f_in == _FEAT_IN
    x = jnp.asarray(x, jnp.float32)

    n_rows = pl.cdiv(B, _SAMPLES_PER_ROW)                      # 128-lane rows of x
    tr = min(_TR_MAX, _round_up(max(pl.cdiv(n_rows, _MIN_TILES), 1), 8))
    n_pad = _round_up(n_rows, tr)
    b_pad = n_pad * _SAMPLES_PER_ROW
    grid = (n_pad // tr,)

    # Free contiguous reshape into the lane/sublane-dense (rows, 128) layout.
    x_flat = x.reshape(-1)
    if b_pad != B:                       # only unaligned batches pay a pad pass
        x_flat = jnp.pad(x_flat, (0, (b_pad - B) * _FEAT_IN))
    x2d = x_flat.reshape(n_pad, _LANES)

    # Fold the feature (de)interleave into block-diagonal MXU operands:
    # (X @ kron(I32, W^T)) applies the 4x4 / 4x2 layer to every 4-lane sample
    # group independently, keeping the data row-major end-to-end.
    w1 = jnp.asarray(w1, jnp.float32)
    w2 = jnp.asarray(w2, jnp.float32)
    eye32 = jnp.eye(_SAMPLES_PER_ROW, dtype=jnp.float32)
    m1 = jnp.kron(eye32, w1.T)                                  # (128, 128)
    m2 = jnp.kron(eye32, w2.T)                                  # (128, 64)
    b1v = jnp.tile(jnp.asarray(b1, jnp.float32), _SAMPLES_PER_ROW).reshape(1, _LANES)
    b2v = jnp.tile(jnp.asarray(b2, jnp.float32), _SAMPLES_PER_ROW).reshape(1, _OUT_COLS)

    out2d = pl.pallas_call(
        _mlp_kernel,
        out_shape=jax.ShapeDtypeStruct((n_pad, _OUT_COLS), jnp.float32),
        grid=grid,
        in_specs=[
            pl.BlockSpec((_LANES, _LANES), lambda i: (0, 0)),     # m1 (resident)
            pl.BlockSpec((1, _LANES), lambda i: (0, 0)),          # b1 plane
            pl.BlockSpec((_LANES, _OUT_COLS), lambda i: (0, 0)),  # m2 (resident)
            pl.BlockSpec((1, _OUT_COLS), lambda i: (0, 0)),       # b2 plane
            pl.BlockSpec((tr, _LANES), lambda i: (i, 0)),         # x batch tile
        ],
        out_specs=pl.BlockSpec((tr, _OUT_COLS), lambda i: (i, 0)),
        compiler_params=pltpu.CompilerParams(
            dimension_semantics=("parallel",),        # shard batch tiles over TCs
            vmem_limit_bytes=32 * 1024 * 1024,        # v5e default scoped = 16 MiB
        ),
        cost_estimate=pl.CostEstimate(
            flops=2 * (_LANES * _LANES + _LANES * _OUT_COLS) * n_pad,
            transcendentals=0,
            bytes_accessed=4 * ((_LANES + _OUT_COLS) * n_pad
                                + _LANES * _LANES + _LANES * _OUT_COLS
                                + _LANES + _OUT_COLS),
        ),
    )(m1, b1v, m2, b2v, x2d)

    # Free reshape back to row-major (B, 2); slice off padded samples if any.
    out = out2d.reshape(b_pad, _FEAT_OUT)
    return out if b_pad == B else out[:B]


def _init_params(key):
    """Deterministic init matching nn.Linear: uniform(-1/sqrt(fan_in), +)."""
    k1, k2, k3, k4 = jax.random.split(key, 4)
    bound = 1.0 / jnp.sqrt(jnp.float32(_FEAT_IN))
    w1 = jax.random.uniform(k1, (_FEAT_HID, _FEAT_IN), jnp.float32, -bound, bound)
    b1 = jax.random.uniform(k2, (_FEAT_HID,), jnp.float32, -bound, bound)
    w2 = jax.random.uniform(k3, (_FEAT_OUT, _FEAT_HID), jnp.float32, -bound, bound)
    b2 = jax.random.uniform(k4, (_FEAT_OUT,), jnp.float32, -bound, bound)
    return w1, b1, w2, b2


def _reference(x, w1, b1, w2, b2):
    # HIGHEST precision keeps the f32 reference truly f32 on TPU (XLA's default
    # dot precision would otherwise round to bf16 and corrupt the comparison).
    hp = jax.lax.Precision.HIGHEST
    h = jnp.maximum(jnp.dot(x, w1.T, precision=hp) + b1, 0.0)
    return jnp.dot(h, w2.T, precision=hp) + b2


if __name__ == "__main__":
    key = jax.random.PRNGKey(0)
    k_x, k_x2, k_p = jax.random.split(key, 3)
    w1, b1, w2, b2 = _init_params(k_p)

    # Small shape consistent with the module (feature dim must be 4).
    batch = 8
    x = jax.random.normal(k_x, (batch, _FEAT_IN), jnp.float32)
    out = jax.block_until_ready(mein_netz_forward(x, w1, b1, w2, b2))
    assert out.shape == (batch, _FEAT_OUT)
    assert jnp.allclose(out, _reference(x, w1, b1, w2, b2), atol=1e-4, rtol=1e-4)

    # Larger, non-aligned batch: exercises padding + the 4-tile parallel grid.
    batch2 = 2600
    x2 = jax.random.normal(k_x2, (batch2, _FEAT_IN), jnp.float32)
    out2 = jax.block_until_ready(mein_netz_forward(x2, w1, b1, w2, b2))
    assert out2.shape == (batch2, _FEAT_OUT)
    assert jnp.allclose(out2, _reference(x2, w1, b1, w2, b2), atol=1e-4, rtol=1e-4)

    print("KERNEL_OK")
</pallas_src>

<mosaic_0001>
module attributes {stable_mosaic.version = 11 : i64} {
  func.func @_mlp_kernel(%arg0: i32, %arg1: memref<128x128xf32, #tpu.memory_space<vmem>>, %arg2: memref<1x128xf32, #tpu.memory_space<vmem>>, %arg3: memref<128x64xf32, #tpu.memory_space<vmem>>, %arg4: memref<1x64xf32, #tpu.memory_space<vmem>>, %arg5: memref<8x128xf32, #tpu.memory_space<vmem>>, %arg6: memref<8x64xf32, #tpu.memory_space<vmem>>) attributes {dimension_semantics = [#tpu.dimension_semantics<parallel>], iteration_bounds = array<i64: 1>, scalar_prefetch = 0 : i64, scratch_operands = 0 : i64, tpu.core_type = #tpu.core_type<tc>, window_params = [{pipeline_mode = #tpu.pipeline_mode<synchronous>, transform_indices = @transform_0, window_bounds = array<i64: 128, 128>}, {pipeline_mode = #tpu.pipeline_mode<synchronous>, transform_indices = @transform_1, window_bounds = array<i64: 1, 128>}, {pipeline_mode = #tpu.pipeline_mode<synchronous>, transform_indices = @transform_2, window_bounds = array<i64: 128, 64>}, {pipeline_mode = #tpu.pipeline_mode<synchronous>, transform_indices = @transform_3, window_bounds = array<i64: 1, 64>}, {transform_indices = @transform_4, window_bounds = array<i64: 8, 128>}, {transform_indices = @transform_5, window_bounds = array<i64: 8, 64>}]} {
    %c0 = arith.constant 0 : index
    %c0_0 = arith.constant 0 : index
    %0 = vector.load %arg5[%c0, %c0_0] : memref<8x128xf32, #tpu.memory_space<vmem>>, vector<8x128xf32>
    %c0_1 = arith.constant 0 : index
    %c0_2 = arith.constant 0 : index
    %1 = vector.load %arg1[%c0_1, %c0_2] : memref<128x128xf32, #tpu.memory_space<vmem>>, vector<128x128xf32>
    %cst = arith.constant dense<0.000000e+00> : vector<8x128xf32>
    %2 = tpu.matmul %0, %1, %cst {dimension_numbers = #tpu.dot_dimension_numbers<[1], [0], [0], [1], [0, 0, 1, 1], [], []>, precision = #tpu.contract_precision<fp32>} : vector<8x128xf32>, vector<128x128xf32>, vector<8x128xf32> -> vector<8x128xf32>
    %c0_3 = arith.constant 0 : index
    %c0_4 = arith.constant 0 : index
    %3 = vector.load %arg2[%c0_3, %c0_4] : memref<1x128xf32, #tpu.memory_space<vmem>>, vector<1x128xf32>
    %4 = vector.broadcast %3 : vector<1x128xf32> to vector<8x128xf32>
    %5 = arith.addf %2, %4 : vector<8x128xf32>
    %cst_5 = arith.constant 0.000000e+00 : f32
    %6 = vector.broadcast %cst_5 : f32 to vector<8x128xf32>
    %7 = arith.maximumf %5, %6 : vector<8x128xf32>
    %c0_6 = arith.constant 0 : index
    %c0_7 = arith.constant 0 : index
    %8 = vector.load %arg3[%c0_6, %c0_7] : memref<128x64xf32, #tpu.memory_space<vmem>>, vector<128x64xf32>
    %cst_8 = arith.constant dense<0.000000e+00> : vector<8x64xf32>
    %9 = tpu.matmul %7, %8, %cst_8 {dimension_numbers = #tpu.dot_dimension_numbers<[1], [0], [0], [1], [0, 0, 1, 1], [], []>, precision = #tpu.contract_precision<fp32>} : vector<8x128xf32>, vector<128x64xf32>, vector<8x64xf32> -> vector<8x64xf32>
    %c0_9 = arith.constant 0 : index
    %c0_10 = arith.constant 0 : index
    %10 = vector.load %arg4[%c0_9, %c0_10] : memref<1x64xf32, #tpu.memory_space<vmem>>, vector<1x64xf32>
    %11 = vector.broadcast %10 : vector<1x64xf32> to vector<8x64xf32>
    %12 = arith.addf %9, %11 : vector<8x64xf32>
    %c0_11 = arith.constant 0 : index
    %c0_12 = arith.constant 0 : index
    %13 = vector.load %arg6[%c0_11, %c0_12] : memref<8x64xf32, #tpu.memory_space<vmem>>, vector<8x64xf32>
    tpu.vector_store %arg6[%c0_11, %c0_12], %12 {strides = array<i32>} : memref<8x64xf32, #tpu.memory_space<vmem>>, vector<8x64xf32>,
    return
  }
  func.func @transform_0(%arg0: i32) -> (i32, i32) {
    %c0_i32 = arith.constant 0 : i32
    %c0_i32_0 = arith.constant 0 : i32
    %c0_i32_1 = arith.constant 0 : i32
    return %c0_i32, %c0_i32_0 : i32, i32
  }
  func.func @transform_1(%arg0: i32) -> (i32, i32) {
    %c0_i32 = arith.constant 0 : i32
    %c0_i32_0 = arith.constant 0 : i32
    %c0_i32_1 = arith.constant 0 : i32
    return %c0_i32, %c0_i32_0 : i32, i32
  }
  func.func @transform_2(%arg0: i32) -> (i32, i32) {
    %c0_i32 = arith.constant 0 : i32
    %c0_i32_0 = arith.constant 0 : i32
    %c0_i32_1 = arith.constant 0 : i32
    return %c0_i32, %c0_i32_0 : i32, i32
  }
  func.func @transform_3(%arg0: i32) -> (i32, i32) {
    %c0_i32 = arith.constant 0 : i32
    %c0_i32_0 = arith.constant 0 : i32
    %c0_i32_1 = arith.constant 0 : i32
    return %c0_i32, %c0_i32_0 : i32, i32
  }
  func.func @transform_4(%arg0: i32) -> (i32, i32) {
    %c0_i32 = arith.constant 0 : i32
    %c0_i32_0 = arith.constant 0 : i32
    return %arg0, %c0_i32 : i32, i32
  }
  func.func @transform_5(%arg0: i32) -> (i32, i32) {
    %c0_i32 = arith.constant 0 : i32
    %c0_i32_0 = arith.constant 0 : i32
    return %arg0, %c0_i32 : i32, i32
  }
}

</mosaic_0001>

<bundles_post_ra>
// kernel: tpu_custom_call.1
= control target key start
LH: loop header
LB: loop body
LE: loop exit
PB: predicated region body
PF: predicated region fallthrough
CT: control target
= control target key end

     0   :  { %v2331_v3 = vmov 0.0|0.0   ;;  %vm2332_vm0 = vmmov 0   ;;  %v2333_v8 = vmov 0.0   ;;  %s2954_s0 = inlined_call_operand.vmem [shape: f32[128,128], index: 0, kind: input, shape index: {}]   ;;  %s2955_s1 = inlined_call_operand.vmem [shape: f32[1,128], index: 1, kind: input, shape index: {}]   ;;  %s2956_s2 = inlined_call_operand.vmem [shape: f32[128,64], index: 2, kind: input, shape index: {}]   ;;  %s2957_s3 = inlined_call_operand.vmem [shape: f32[1,64], index: 3, kind: input, shape index: {}]   ;;  %s2958_s4 = inlined_call_operand.vmem [shape: f32[8,128], index: 4, kind: input, shape index: {}]   ;;  %s2959_s5 = inlined_call_operand.hbm [shape: f32[8,64], index: 5, kind: output, shape index: {}]  }
   0x1   :  { %v22_v0 = vld [vmem:[%s2954_s0] sm:$0xff]  ;;  %v23_v1 = vld [vmem:[%s2954_s0 + $0x8] sm:$0xff]  ;;  %v24_v2 = vld [vmem:[%s2954_s0 + $0x10] sm:$0xff]  ;;  %1993 = vmatprep.subr.bf16.mxu0 %v2331_v3  ;;  %1605 = vmatprep.mubr.msk.f32.mxu0 %vm2332_vm0, %v2333_v8 }
   0x2   :  { %v46_v4 = vand.u32 4294901760, %v22_v0  ;;  %v49_v5 = vand.u32 4294901760, %v23_v1  ;;  %v25_v6 = vld [vmem:[%s2954_s0 + $0x18] sm:$0xff]  ;;  %v52_v7 = vand.u32 4294901760, %v24_v2  ;;  %v26_v10 = vld [vmem:[%s2954_s0 + $0x20] sm:$0xff]  ;;  %v27_v11 = vld [vmem:[%s2954_s0 + $0x28] sm:$0xff]  ;;  %2137 = vmatprep.subr.bf16.mxu1 %v2331_v3  ;;  %1815 = vmatprep.mubr.msk.f32.mxu1 %vm2332_vm0, %v2333_v8 }
   0x3   :  { %v55_v9 = vand.u32 4294901760, %v25_v6  ;;  %v58_v14 = vand.u32 4294901760, %v26_v10  ;;  %v61_v15 = vand.u32 4294901760, %v27_v11  ;;  %v28_v16 = vld [vmem:[%s2954_s0 + $0x30] sm:$0xff]  ;;  %v29_v17 = vld [vmem:[%s2954_s0 + $0x38] sm:$0xff] }
   0x4   :  { %v2389_v12 = vpack.c.bf16 %v49_v5, %v46_v4 }
   0x5   :  { %v2392_v13 = vpack.c.bf16 %v55_v9, %v52_v7 }
   0x6   :  { %1995 = vmatpush3.bf16.msra.mxu0 %v2389_v12 }
   0x7   :  { %1996 = vmatprep.subr.bf16.mxu0 %v2331_v3 }
   0x8   :  { %10 = vsyncpa [#allocation3], 0  ;;  %v2402_v18 = vpack.c.bf16 %v61_v15, %v58_v14  ;;  %v64_v19 = vand.u32 4294901760, %v28_v16  ;;  %v67_v20 = vand.u32 4294901760, %v29_v17  ;;  %v30_v21 = vld [vmem:[%s2954_s0 + $0x40] sm:$0xff]  ;;  %v31_v22 = vld [vmem:[%s2954_s0 + $0x48] sm:$0xff]  ;;  %v2414_v24 = vsub.f32 %v22_v0, %v46_v4 }
   0x9   :  { %v21_v23 = vld [vmem:[%s2958_s4] sm:$0xff]  ;;  %v2416_v25 = vsub.f32 %v23_v1, %v49_v5  ;;  %v70_v27 = vand.u32 4294901760, %v30_v21  ;;  %v73_v28 = vand.u32 4294901760, %v31_v22  ;;  %v32_v29 = vld [vmem:[%s2954_s0 + $0x50] sm:$0xff]  ;;  %v33_v30 = vld [vmem:[%s2954_s0 + $0x58] sm:$0xff]  ;;  %v2433_v33 = vsub.f32 %v24_v2, %v52_v7  ;;  %s2334_s7 = smov [#allocation2]  }
   0xa   :  { %1998 = vmatpush3.bf16.msra.mxu0 %v2392_v13  ;;  %v2419_v26 = vpack.c.bf16 %v67_v20, %v64_v19  ;;  %v2428_v31 = vand.u32 4294901760, %v21_v23  ;;  %v34_v32 = vld [vmem:[%s2954_s0 + $0x60] sm:$0xff]  ;;  %v76_v34 = vand.u32 4294901760, %v32_v29  ;;  %v35_v35 = vld [vmem:[%s2954_s0 + $0x68] sm:$0xff]  ;;  %v36_v36 = vld [vmem:[%s2954_s0 + $0x70] sm:$0xff]  ;;  %v79_v39 = vand.u32 4294901760, %v33_v30 }
   0xb   :  { %1999 = vmatprep.subr.bf16.mxu0 %v2331_v3  ;;  %v37_v37 = vld [vmem:[%s2954_s0 + $0x78] sm:$0xff]  ;;  %v2445_v38 = vpack.c.bf16 %v73_v28, %v70_v27  ;;  %v139_v40 = vand.u32 4294901760, %v2414_v24  ;;  %v146_v41 = vand.u32 4294901760, %v2416_v25  ;;  %v2449_v42 = vsub.f32 %v25_v6, %v55_v9  ;;  %s1359_s8 = sshll.u32 %s2334_s7, 4  ;;  %s1360_s8 = int_to_ptr.vmem [resolvable:$true] %s1359_s8 }
   0xc   :  { %v2451_v43 = vsub.f32 %v26_v10, %v58_v14  ;;  %v2453_v44 = vsub.f32 %v27_v11, %v61_v15  ;;  %v2457_v45 = vsub.f32 %v21_v23, %v2428_v31  ;;  %v82_v46 = vand.u32 4294901760, %v34_v32  ;;  %s2307_s9 = scalar_lea.vmem %s1360_s8, 128  ;;  %p2312_p1 = scmp.lt.s32.totalorder %s1360_s8, %s1360_s8 }
   0xd   :  { %v85_v47 = vand.u32 4294901760, %v35_v35  ;;  %v88_v48 = vand.u32 4294901760, %v36_v36  ;;  %v91_v49 = vand.u32 4294901760, %v37_v37  ;;  %v2459_v50 = vsub.f32 %v28_v16, %v64_v19  ;;  %p2308_p0 = scmp.ne.s32.totalorder %s1360_s8, %s2307_s9  ;;  %p2313_p2 = scmp.lt.s32.totalorder %s2307_s9, %s2307_s9 }
   0xe   :  { %2001 = vmatpush3.bf16.msra.mxu0 %v2402_v18  ;;  %v2461_v51 = vsub.f32 %v29_v17, %v67_v20  ;;  %v2463_v52 = vsub.f32 %v30_v21, %v70_v27  ;;  %v153_v53 = vand.u32 4294901760, %v2433_v33  ;;  %v2467_v54 = vsub.f32 %v31_v22, %v73_v28 }
   0xf   :  { %2002 = vmatprep.subr.bf16.mxu0 %v2331_v3  ;;  %v2469_v55 = vpack.c.bf16 %v79_v39, %v76_v34  ;;  %v140_v56 = vsub.f32 %v2414_v24, %v139_v40  ;;  %v147_v57 = vsub.f32 %v2416_v25, %v146_v41  ;;  %v2474_v58 = vsub.f32 %v32_v29, %v76_v34  ;;  %p2314_p3 = por %p2313_p2, %p2312_p1 }
  0x10   :  { %v2476_v59 = vsub.f32 %v33_v30, %v79_v39  ;;  %v2478_v60 = vsub.f32 %v34_v32, %v82_v46  ;;  %v128_v61 = vand.u32 4294901760, %v2457_v45  ;;  %v2481_v62 = vpack.c.bf16 %v85_v47, %v82_v46 }
  0x11   :  { %v2483_v63 = vsub.f32 %v35_v35, %v85_v47  ;;  %v2485_v0 = vpack.c.bf16 %v91_v49, %v88_v48  ;;  %v2487_v1 = vsub.f32 %v36_v36, %v88_v48  ;;  %v2489_v2 = vsub.f32 %v37_v37, %v91_v49  ;;  %p2315_p4 = pnand %p2314_p3, %p2308_p0 }
  0x12   :  { %2004 = vmatpush3.bf16.msra.mxu0 %v2419_v26  ;;  %v154_v4 = vsub.f32 %v2433_v33, %v153_v53  ;;  %v160_v5 = vand.u32 4294901760, %v2449_v42  ;;  %v167_v6 = vand.u32 4294901760, %v2451_v43  ;;  %v141_v7 = vand.u32 4294901760, %v140_v56 }
  0x13   :  { %2005 = vmatprep.subr.bf16.mxu0 %v2331_v3  ;;  %v148_v9 = vand.u32 4294901760, %v147_v57  ;;  %v174_v10 = vand.u32 4294901760, %v2453_v44  ;;  %v181_v11 = vand.u32 4294901760, %v2459_v50  ;;  %v129_v14 = vsub.f32 %v2457_v45, %v128_v61 }
  0x14   :  { %v188_v15 = vand.u32 4294901760, %v2461_v51  ;;  %v195_v16 = vand.u32 4294901760, %v2463_v52  ;;  %v202_v17 = vand.u32 4294901760, %v2467_v54  ;;  %v209_v19 = vand.u32 4294901760, %v2474_v58 }
  0x15   :  { %v216_v20 = vand.u32 4294901760, %v2476_v59  ;;  %v223_v21 = vand.u32 4294901760, %v2478_v60  ;;  %v230_v22 = vand.u32 4294901760, %v2483_v63  ;;  %v237_v23 = vand.u32 4294901760, %v2487_v1 }
  0x16   :  { %2007 = vmatpush3.bf16.msra.mxu0 %v2445_v38  ;;  %v244_v27 = vand.u32 4294901760, %v2489_v2  ;;  %v2510_v28 = vpack.c.bf16 %v146_v41, %v139_v40  ;;  %v2512_v29 = vpack.c.bf16 %v160_v5, %v153_v53  ;;  %v161_v30 = vsub.f32 %v2449_v42, %v160_v5 }
  0x17   :  { %2008 = vmatprep.subr.bf16.mxu0 %v2331_v3  ;;  %v2516_v32 = vpack.c.bf16 %v174_v10, %v167_v6  ;;  %v2518_v34 = vpack.c.bf16 %v188_v15, %v181_v11  ;;  %v2520_v35 = vpack.c.bf16 %v202_v17, %v195_v16  ;;  %v2523_v36 = vpack.c.bf16 %v216_v20, %v209_v19 }
  0x18   :  { %v2525_v37 = vpack.c.bf16 %v230_v22, %v223_v21  ;;  %v2527_v39 = vpack.c.bf16 %v244_v27, %v237_v23  ;;  %v130_v40 = vand.u32 4294901760, %v129_v14  ;;  %v155_v41 = vand.u32 4294901760, %v154_v4 }
  0x19   :  { %v2018_v46 = vpack.c.bf16 %v148_v9, %v141_v7  ;;  %v162_v47 = vand.u32 4294901760, %v161_v30  ;;  %v168_v48 = vsub.f32 %v2451_v43, %v167_v6  ;;  %v175_v49 = vsub.f32 %v2453_v44, %v174_v10 }
  0x1a   :  { %2010 = vmatpush3.bf16.msra.mxu0 %v2469_v55  ;;  %v182_v53 = vsub.f32 %v2459_v50, %v181_v11  ;;  %v189_v14 = vsub.f32 %v2461_v51, %v188_v15  ;;  %v196_v4 = vsub.f32 %v2463_v52, %v195_v16  ;;  %v203_v10 = vsub.f32 %v2467_v54, %v202_v17 }
  0x1b   :  { %2011 = vmatprep.subr.bf16.mxu0 %v2331_v3  ;;  %v2021_v56 = vpack.c.bf16 %v162_v47, %v155_v41  ;;  %v169_v57 = vand.u32 4294901760, %v168_v48  ;;  %v176_v5 = vand.u32 4294901760, %v175_v49  ;;  %v210_v15 = vsub.f32 %v2474_v58, %v209_v19 }
  0x1c   :  { %v183_v7 = vand.u32 4294901760, %v182_v53  ;;  %v190_v9 = vand.u32 4294901760, %v189_v14  ;;  %v197_v11 = vand.u32 4294901760, %v196_v4  ;;  %v217_v41 = vsub.f32 %v2476_v59, %v216_v20  ;;  %v689_v4 = vld [vmem:[%s2956_s2 + $0x10] sm:$0xff] }
  0x1d   :  { %v2024_v6 = vpack.c.bf16 %v176_v5, %v169_v57  ;;  %v224_v16 = vsub.f32 %v2478_v60, %v223_v21  ;;  %v211_v47 = vand.u32 4294901760, %v210_v15  ;;  %v231_v17 = vsub.f32 %v2483_v63, %v230_v22  ;;  %v694_v15 = vld [vmem:[%s2956_s2 + $0x38] sm:$0xff] }
  0x1e   :  { %2013 = vmatpush3.bf16.msra.mxu0 %v2481_v62  ;;  %v2027_v30 = vpack.c.bf16 %v190_v9, %v183_v7  ;;  %v218_v48 = vand.u32 4294901760, %v217_v41  ;;  %v238_v19 = vsub.f32 %v2487_v1, %v237_v23  ;;  %v245_v20 = vsub.f32 %v2489_v2, %v244_v27  ;;  %v687_v23 = vld [vmem:[%s2956_s2] sm:$0xff]  ;;  %v688_v27 = vld [vmem:[%s2956_s2 + $0x8] sm:$0xff]  ;;  %v690_v7 = vld [vmem:[%s2956_s2 + $0x18] sm:$0xff] }
  0x1f   :  { %2014 = vmatprep.subr.bf16.mxu0 %v2331_v3  ;;  %v225_v49 = vand.u32 4294901760, %v224_v16  ;;  %v2042_v14 = vpack.c.bf16 %v2416_v25, %v2414_v24  ;;  %v2045_v24 = vpack.c.bf16 %v2449_v42, %v2433_v33  ;;  %v711_v25 = vand.u32 4294901760, %v687_v23  ;;  %v695_v41 = vld [vmem:[%s2956_s2 + $0x40] sm:$0xff] }
  0x20   :  { %v2033_v53 = vpack.c.bf16 %v218_v48, %v211_v47  ;;  %v239_v57 = vand.u32 4294901760, %v238_v19  ;;  %v246_v5 = vand.u32 4294901760, %v245_v20  ;;  %v717_v9 = vand.u32 4294901760, %v689_v4 }
  0x21   :  { %v720_v33 = vand.u32 4294901760, %v690_v7  ;;  %vm1351_vm1 = vcmask 523264  }
  0x22   :  { %2016 = vmatpush3.bf16.msra.mxu0 %v2485_v0  ;;  %v2039_v22 = vpack.c.bf16 %v246_v5, %v239_v57  ;;  %v2594_v48 = vsub.f32 %v689_v4, %v717_v9  ;;  %v732_v57 = vand.u32 4294901760, %v694_v15  ;;  %v735_v5 = vand.u32 4294901760, %v695_v41 }
  0x23   :  { %2017 = vmatprep.subr.bf16.mxu0 %v2331_v3 }
  0x25   :  { %1606 = vmatmul.mubr.f32.vlgmr.msra.gmra.mrb[0].mxu0 %v130_v40  ;;  %v204_v40 = vand.u32 4294901760, %v203_v10  ;;  %v691_v10 = vld [vmem:[%s2956_s2 + $0x20] sm:$0xff] }
  0x26   :  { %2019 = vmatpush3.bf16.msra.mxu0 %v2018_v46  ;;  %1640 = vmatprep.mubr.msk.f32.mxu0 %vm2332_vm0, %v2333_v8  ;;  %v723_v42 = vand.u32 4294901760, %v691_v10 }
  0x27   :  { %2020 = vmatprep.subr.bf16.mxu0 %v2331_v3  ;;  %v2030_v46 = vpack.c.bf16 %v204_v40, %v197_v11  ;;  %v692_v11 = vld [vmem:[%s2956_s2 + $0x28] sm:$0xff]  ;;  %v693_v40 = vld [vmem:[%s2956_s2 + $0x30] sm:$0xff] }
  0x28   :  { %v2605_v19 = vsub.f32 %v691_v10, %v723_v42 }
  0x2a   :  { %2022 = vmatpush3.bf16.msra.mxu0 %v2021_v56  ;;  %v232_v56 = vand.u32 4294901760, %v231_v17  ;;  %v696_v17 = vld [vmem:[%s2956_s2 + $0x48] sm:$0xff] }
  0x2b   :  { %2023 = vmatprep.subr.bf16.mxu0 %v2331_v3 }
  0x2c   :  { %v2036_v21 = vpack.c.bf16 %v232_v56, %v225_v49  ;;  %v2048_v49 = vpack.c.bf16 %v2453_v44, %v2451_v43  ;;  %v2603_v56 = vsub.f32 %v690_v7, %v720_v33  ;;  %v2614_v44 = vsub.f32 %v694_v15, %v732_v57 }
  0x2d   :  { %v818_v7 = vand.u32 4294901760, %v2594_v48  ;;  %v832_v15 = vand.u32 4294901760, %v2605_v19 }
  0x2e   :  { %2025 = vmatpush3.bf16.msra.mxu0 %v2024_v6  ;;  %v714_v6 = vand.u32 4294901760, %v688_v27 }
  0x2f   :  { %2026 = vmatprep.subr.bf16.mxu0 %v2331_v3 }
  0x30   :  { %v2588_v16 = vpack.c.bf16 %v714_v6, %v711_v25  ;;  %v2592_v47 = vsub.f32 %v688_v27, %v714_v6  ;;  %v2051_v27 = vpack.c.bf16 %v2461_v51, %v2459_v50  ;;  %v2057_v50 = vpack.c.bf16 %v2476_v59, %v2474_v58 }
  0x32   :  { %2028 = vmatpush3.bf16.msra.mxu0 %v2027_v30  ;;  %v726_v30 = vand.u32 4294901760, %v692_v11  ;;  %2139 = vmatpush3.bf16.msra.mxu1 %v2588_v16 }
  0x33   :  { %2029 = vmatprep.subr.bf16.mxu0 %v2331_v3  ;;  %2140 = vmatprep.subr.bf16.mxu1 %v2331_v3 }
  0x34   :  { %v2608_v20 = vsub.f32 %v692_v11, %v726_v30  ;;  %v2623_v4 = vpack.c.bf16 %v726_v30, %v723_v42  ;;  %v819_v11 = vsub.f32 %v2594_v48, %v818_v7 }
  0x36   :  { %2031 = vmatpush3.bf16.msra.mxu0 %v2030_v46  ;;  %v2590_v46 = vsub.f32 %v687_v23, %v711_v25  ;;  %v820_v30 = vand.u32 4294901760, %v819_v11 }
  0x37   :  { %2032 = vmatprep.subr.bf16.mxu0 %v2331_v3 }
  0x3a   :  { %2034 = vmatpush3.bf16.msra.mxu0 %v2033_v53  ;;  %v2601_v53 = vpack.c.bf16 %v720_v33, %v717_v9  ;;  %v825_v9 = vand.u32 4294901760, %v2603_v56 }
  0x3b   :  { %2035 = vmatprep.subr.bf16.mxu0 %v2331_v3 }
  0x3c   :  { %2142 = vmatpush3.bf16.msra.mxu1 %v2601_v53  ;;  %v826_v33 = vsub.f32 %v2603_v56, %v825_v9 }
  0x3d   :  { %2143 = vmatprep.subr.bf16.mxu1 %v2331_v3 }
  0x3e   :  { %2037 = vmatpush3.bf16.msra.mxu0 %v2036_v21  ;;  %v729_v21 = vand.u32 4294901760, %v693_v40 }
  0x3f   :  { %2038 = vmatprep.subr.bf16.mxu0 %v2331_v3 }
  0x40   :  { %v2612_v43 = vsub.f32 %v693_v40, %v729_v21  ;;  %2145 = vmatpush3.bf16.msra.mxu1 %v2623_v4  ;;  %v2630_v25 = vpack.c.bf16 %v732_v57, %v729_v21  ;;  %v827_v40 = vand.u32 4294901760, %v826_v33 }
  0x41   :  { %2146 = vmatprep.subr.bf16.mxu1 %v2331_v3 }
  0x42   :  { %2040 = vmatpush3.bf16.msra.mxu0 %v2039_v22  ;;  %v738_v22 = vand.u32 4294901760, %v696_v17 }
  0x43   :  { %2041 = vmatprep.subr.bf16.mxu0 %v2331_v3 }
  0x44   :  { %v2618_v23 = vsub.f32 %v696_v17, %v738_v22  ;;  %2148 = vmatpush3.bf16.msra.mxu1 %v2630_v25  ;;  %v2637_v51 = vpack.c.bf16 %v738_v22, %v735_v5  ;;  %v2165_v17 = vpack.c.bf16 %v827_v40, %v820_v30  ;;  %v846_v22 = vand.u32 4294901760, %v2612_v43 }
  0x45   :  { %1641 = vmatmul.mubr.f32.vlgmr.msra.gmra.mrb[0].mxu0 %v2428_v31  ;;  %2149 = vmatprep.subr.bf16.mxu1 %v2331_v3 }
  0x46   :  { %2043 = vmatpush3.bf16.msra.mxu0 %v2042_v14  ;;  %1675 = vmatprep.mubr.msk.f32.mxu0 %vm2332_vm0, %v2333_v8  ;;  %v2616_v14 = vsub.f32 %v695_v41, %v735_v5  ;;  %v839_v41 = vand.u32 4294901760, %v2608_v20 }
  0x47   :  { %2044 = vmatprep.subr.bf16.mxu0 %v2331_v3 }
  0x48   :  { %2151 = vmatpush3.bf16.msra.mxu1 %v2637_v51  ;;  %v840_v21 = vsub.f32 %v2608_v20, %v839_v41 }
  0x49   :  { %2152 = vmatprep.subr.bf16.mxu1 %v2331_v3 }
  0x4a   :  { %2046 = vmatpush3.bf16.msra.mxu0 %v2045_v24  ;;  %v2054_v24 = vpack.c.bf16 %v2467_v54, %v2463_v52  ;;  %v2060_v52 = vpack.c.bf16 %v2483_v63, %v2478_v60  ;;  %v2063_v54 = vpack.c.bf16 %v2489_v2, %v2487_v1  ;;  %v701_v60 = vld [vmem:[%s2956_s2 + $0x70] sm:$0xff]  ;;  %v841_v5 = vand.u32 4294901760, %v840_v21 }
  0x4b   :  { %2047 = vmatprep.subr.bf16.mxu0 %v2331_v3  ;;  %v753_v2 = vand.u32 4294901760, %v701_v60 }
  0x4e   :  { %2049 = vmatpush3.bf16.msra.mxu0 %v2048_v49  ;;  %v833_v49 = vsub.f32 %v2605_v19, %v832_v15 }
  0x4f   :  { %2050 = vmatprep.subr.bf16.mxu0 %v2331_v3 }
  0x50   :  { %v834_v57 = vand.u32 4294901760, %v833_v49 }
  0x52   :  { %2052 = vmatpush3.bf16.msra.mxu0 %v2051_v27  ;;  %v853_v27 = vand.u32 4294901760, %v2614_v44 }
  0x53   :  { %2053 = vmatprep.subr.bf16.mxu0 %v2331_v3 }
  0x56   :  { %2055 = vmatpush3.bf16.msra.mxu0 %v2054_v24  ;;  %v2168_v24 = vpack.c.bf16 %v841_v5, %v834_v57 }
  0x57   :  { %2056 = vmatprep.subr.bf16.mxu0 %v2331_v3 }
  0x5a   :  { %2058 = vmatpush3.bf16.msra.mxu0 %v2057_v50  ;;  %v847_v50 = vsub.f32 %v2612_v43, %v846_v22 }
  0x5b   :  { %2059 = vmatprep.subr.bf16.mxu0 %v2331_v3 }
  0x5e   :  { %2061 = vmatpush3.bf16.msra.mxu0 %v2060_v52  ;;  %v854_v52 = vsub.f32 %v2614_v44, %v853_v27 }
  0x5f   :  { %2062 = vmatprep.subr.bf16.mxu0 %v2331_v3 }
  0x62   :  { %2064 = vmatpush3.bf16.msra.mxu0 %v2063_v54  ;;  %v848_v54 = vand.u32 4294901760, %v847_v50 }
  0x63   :  { %2065 = vmatprep.subr.bf16.mxu0 %v2331_v3 }
  0x65   :  { %1676 = vmatmul.mubr.f32.vlgmr.msra.gmra.mrb[0].mxu0 %v2457_v45  ;;  %v699_v45 = vld [vmem:[%s2956_s2 + $0x60] sm:$0xff] }
  0x66   :  { %2067 = vmatpush3.bf16.msra.mxu0 %v2389_v12  ;;  %1710 = vmatprep.mubr.msk.f32.mxu0 %vm2332_vm0, %v2333_v8 }
  0x67   :  { %2068 = vmatprep.subr.bf16.mxu0 %v2331_v3 }
  0x6a   :  { %2070 = vmatpush3.bf16.msra.mxu0 %v2392_v13 }
  0x6b   :  { %2071 = vmatprep.subr.bf16.mxu0 %v2331_v3 }
  0x6e   :  { %2073 = vmatpush3.bf16.msra.mxu0 %v2402_v18 }
  0x6f   :  { %2074 = vmatprep.subr.bf16.mxu0 %v2331_v3 }
  0x72   :  { %2076 = vmatpush3.bf16.msra.mxu0 %v2419_v26 }
  0x73   :  { %2077 = vmatprep.subr.bf16.mxu0 %v2331_v3 }
  0x76   :  { %2079 = vmatpush3.bf16.msra.mxu0 %v2445_v38 }
  0x77   :  { %2080 = vmatprep.subr.bf16.mxu0 %v2331_v3 }
  0x7a   :  { %2082 = vmatpush3.bf16.msra.mxu0 %v2469_v55 }
  0x7b   :  { %2083 = vmatprep.subr.bf16.mxu0 %v2331_v3 }
  0x7e   :  { %2085 = vmatpush3.bf16.msra.mxu0 %v2481_v62 }
  0x7f   :  { %2086 = vmatprep.subr.bf16.mxu0 %v2331_v3 }
  0x82   :  { %2088 = vmatpush3.bf16.msra.mxu0 %v2485_v0 }
  0x83   :  { %2089 = vmatprep.subr.bf16.mxu0 %v2331_v3 }
  0x85   :  { %1711 = vmatmul.mubr.f32.vlgmr.msra.gmra.mrb[0].mxu0 %v128_v61  ;;  %v702_v61 = vld [vmem:[%s2956_s2 + $0x78] sm:$0xff] }
  0x86   :  { %2091 = vmatpush3.bf16.msra.mxu0 %v2510_v28  ;;  %1745 = vmatprep.mubr.msk.f32.mxu0 %vm2332_vm0, %v2333_v8  ;;  %v756_v28 = vand.u32 4294901760, %v702_v61 }
  0x87   :  { %2092 = vmatprep.subr.bf16.mxu0 %v2331_v3 }
  0x8a   :  { %2094 = vmatpush3.bf16.msra.mxu0 %v2512_v29  ;;  %v804_v29 = vand.u32 4294901760, %v2590_v46 }
  0x8b   :  { %2095 = vmatprep.subr.bf16.mxu0 %v2331_v3 }
  0x8e   :  { %2097 = vmatpush3.bf16.msra.mxu0 %v2516_v32  ;;  %v811_v32 = vand.u32 4294901760, %v2592_v47 }
  0x8f   :  { %2098 = vmatprep.subr.bf16.mxu0 %v2331_v3 }
  0x92   :  { %2100 = vmatpush3.bf16.msra.mxu0 %v2518_v34  ;;  %v2744_v34 = vpack.c.bf16 %v756_v28, %v753_v2 }
  0x93   :  { %2101 = vmatprep.subr.bf16.mxu0 %v2331_v3 }
  0x96   :  { %2103 = vmatpush3.bf16.msra.mxu0 %v2520_v35  ;;  %v2746_v35 = vsub.f32 %v701_v60, %v753_v2 }
  0x97   :  { %2104 = vmatprep.subr.bf16.mxu0 %v2331_v3 }
  0x98   :  { %v2961_v57 = vand.u32 4294901760, %v2746_v35 }
  0x9a   :  { %2106 = vmatpush3.bf16.msra.mxu0 %v2523_v36  ;;  %v2748_v36 = vsub.f32 %v702_v61, %v756_v28 }
  0x9b   :  { %2107 = vmatprep.subr.bf16.mxu0 %v2331_v3 }
  0x9c   :  { %v2960_v5 = vand.u32 4294901760, %v2748_v36 }
  0x9e   :  { %2109 = vmatpush3.bf16.msra.mxu0 %v2525_v37  ;;  %v805_v37 = vsub.f32 %v2590_v46, %v804_v29 }
  0x9f   :  { %2110 = vmatprep.subr.bf16.mxu0 %v2331_v3 }
  0xa0   :  { %v806_v6 = vand.u32 4294901760, %v805_v37 }
  0xa2   :  { %2112 = vmatpush3.bf16.msra.mxu0 %v2527_v39  ;;  %v812_v39 = vsub.f32 %v2592_v47, %v811_v32 }
  0xa3   :  { %2113 = vmatprep.subr.bf16.mxu0 %v2331_v3 }
  0xa4   :  { %v813_v10 = vand.u32 4294901760, %v812_v39 }
  0xa5   :  { %1746 = vmatmul.mubr.f32.vlgmr.msra.gmra.mrb[0].mxu0 %v2428_v31 }
  0xa6   :  { %2115 = vmatpush3.bf16.msra.mxu0 %v2389_v12  ;;  %1780 = vmatprep.mubr.msk.f32.mxu0 %vm2332_vm0, %v2333_v8  ;;  %v697_v12 = vld [vmem:[%s2956_s2 + $0x50] sm:$0xff]  ;;  %v2766_v42 = vpack.c.bf16 %v813_v10, %v806_v6 }
  0xa7   :  { %2116 = vmatprep.subr.bf16.mxu0 %v2331_v3 }
  0xaa   :  { %2118 = vmatpush3.bf16.msra.mxu0 %v2392_v13  ;;  %v698_v13 = vld [vmem:[%s2956_s2 + $0x58] sm:$0xff] }
  0xab   :  { %2119 = vmatprep.subr.bf16.mxu0 %v2331_v3 }
  0xae   :  { %2121 = vmatpush3.bf16.msra.mxu0 %v2402_v18  ;;  %v741_v18 = vand.u32 4294901760, %v697_v12 }
  0xaf   :  { %2122 = vmatprep.subr.bf16.mxu0 %v2331_v3 }
  0xb2   :  { %2124 = vmatpush3.bf16.msra.mxu0 %v2419_v26  ;;  %v744_v26 = vand.u32 4294901760, %v698_v13 }
  0xb3   :  { %2125 = vmatprep.subr.bf16.mxu0 %v2331_v3 }
  0xb4   :  { %v2734_v63 = vsub.f32 %v698_v13, %v744_v26  ;;  %v860_v13 = vand.u32 4294901760, %v2616_v14 }
  0xb6   :  { %2127 = vmatpush3.bf16.msra.mxu0 %v2445_v38  ;;  %v2714_v38 = vpack.c.bf16 %v744_v26, %v741_v18  ;;  %v881_v61 = vand.u32 4294901760, %v2734_v63 }
  0xb7   :  { %2128 = vmatprep.subr.bf16.mxu0 %v2331_v3 }
  0xb8   :  { %2154 = vmatpush3.bf16.msra.mxu1 %v2714_v38  ;;  %v882_v37 = vsub.f32 %v2734_v63, %v881_v61 }
  0xb9   :  { %2155 = vmatprep.subr.bf16.mxu1 %v2331_v3 }
  0xba   :  { %2130 = vmatpush3.bf16.msra.mxu0 %v2469_v55  ;;  %v747_v55 = vand.u32 4294901760, %v699_v45  ;;  %v883_v6 = vand.u32 4294901760, %v882_v37  ;;  %v2195_v37 = vpack.c.bf16 %v2614_v44, %v2612_v43  ;;  %v2966_v44 = vand.u32 4294901760, %v2746_v35 }
  0xbb   :  { %2131 = vmatprep.subr.bf16.mxu0 %v2331_v3 }
  0xbe   :  { %2133 = vmatpush3.bf16.msra.mxu0 %v2481_v62  ;;  %v2732_v62 = vsub.f32 %v697_v12, %v741_v18  ;;  %v855_v12 = vand.u32 4294901760, %v854_v52  ;;  %v867_v18 = vand.u32 4294901760, %v2618_v23  ;;  %v903_v52 = vsub.f32 %v2746_v35, %v2961_v57 }
  0xbf   :  { %2134 = vmatprep.subr.bf16.mxu0 %v2331_v3 }
  0xc0   :  { %v2171_v26 = vpack.c.bf16 %v855_v12, %v848_v54  ;;  %v874_v60 = vand.u32 4294901760, %v2732_v62  ;;  %v910_v54 = vsub.f32 %v2748_v36, %v2960_v5  ;;  %v904_v12 = vand.u32 4294901760, %v903_v52 }
  0xc2   :  { %2136 = vmatpush3.bf16.msra.mxu0 %v2485_v0  ;;  %v2737_v0 = vsub.f32 %v699_v45, %v747_v55  ;;  %v861_v45 = vsub.f32 %v2616_v14, %v860_v13  ;;  %v875_v28 = vsub.f32 %v2732_v62, %v874_v60 }
  0xc4   :  { %v876_v39 = vand.u32 4294901760, %v875_v28  ;;  %v2963_v10 = vand.u32 4294901760, %v2737_v0  ;;  %v2192_v28 = vpack.c.bf16 %v2608_v20, %v2605_v19  ;;  %v2964_v19 = vand.u32 4294901760, %v2737_v0 }
  0xc5   :  { %1781 = vmatmul.mubr.f32.vlgmr.msra.gmra.mrb[0].mxu0 %v2428_v31  ;;  %v700_v31 = vld [vmem:[%s2956_s2 + $0x68] sm:$0xff] }
  0xc6   :  { %v750_v58 = vand.u32 4294901760, %v700_v31  ;;  %v2177_v33 = vpack.c.bf16 %v883_v6, %v876_v39  ;;  %v889_v30 = vsub.f32 %v2737_v0, %v2963_v10  ;;  %v2198_v39 = vpack.c.bf16 %v2618_v23, %v2616_v14 }
  0xc7   :  { %v2201_v6 = vpack.c.bf16 %v2734_v63, %v2732_v62  ;;  %v2967_v14 = vand.u32 4294901760, %v2748_v36 }
  0xc8   :  { %v2724_v59 = vpack.c.bf16 %v750_v58, %v747_v55  ;;  %v2739_v1 = vsub.f32 %v700_v31, %v750_v58  ;;  %v868_v31 = vsub.f32 %v2618_v23, %v867_v18  ;;  %v862_v55 = vand.u32 4294901760, %v861_v45 }
  0xc9   :  { %v890_v49 = vand.u32 4294901760, %v889_v30  ;;  %v911_v45 = vand.u32 4294901760, %v910_v54  ;;  %v2255_v23 = vpack.c.bf16 %v2967_v14, %v2966_v44 }
  0xca   :  { %2157 = vmatpush3.bf16.msra.mxu1 %v2724_v59  ;;  %v869_v58 = vand.u32 4294901760, %v868_v31  ;;  %v2962_v11 = vand.u32 4294901760, %v2739_v1  ;;  %v2204_v30 = vpack.c.bf16 %v2739_v1, %v2737_v0  ;;  %v2965_v20 = vand.u32 4294901760, %v2739_v1 }
  0xcb   :  { %2158 = vmatprep.subr.bf16.mxu1 %v2331_v3  ;;  %v2183_v31 = vpack.c.bf16 %v911_v45, %v904_v12 }
  0xcc   :  { %v2174_v2 = vpack.c.bf16 %v869_v58, %v862_v55  ;;  %v896_v40 = vsub.f32 %v2739_v1, %v2962_v11  ;;  %v2186_v55 = vpack.c.bf16 %v2592_v47, %v2590_v46  ;;  %v2189_v58 = vpack.c.bf16 %v2603_v56, %v2594_v48 }
  0xcd   :  { %v2240_v46 = vpack.c.bf16 %v839_v41, %v832_v15  ;;  %v2243_v47 = vpack.c.bf16 %v853_v27, %v846_v22  ;;  %v2246_v48 = vpack.c.bf16 %v867_v18, %v860_v13  ;;  %v2249_v56 = vpack.c.bf16 %v881_v61, %v874_v60 }
  0xce   :  { %2160 = vmatpush3.bf16.msra.mxu1 %v2744_v34  ;;  %v897_v21 = vand.u32 4294901760, %v896_v40  ;;  %v2207_v40 = vpack.c.bf16 %v2748_v36, %v2746_v35  ;;  %v2252_v43 = vpack.c.bf16 %v2965_v20, %v2964_v19 }
  0xcf   :  { %2161 = vmatprep.subr.bf16.mxu1 %v2331_v3 }
  0xd0   :  { %v2180_v50 = vpack.c.bf16 %v897_v21, %v890_v49  ;;  %v1367_v49 = vld [vmem:[%s2955_s1] ss:$0 sm:$0xff] }
 0x198   :  { %v682_v21 = vpop.f32.mrb[0].mxu0 }
 0x199   :  { %v2281_v52 = vadd.f32 %v1367_v49, %v682_v21  ;;  %v1782_v54 = vpop.f32.mrb[1].mxu0 }
 0x19b   :  { %v686_v12 = vmax.f32 %v2281_v52, 0.0 }
 0x19d   :  { %v2835_v45 = vand.u32 4294901760, %v686_v12 }
 0x19f   :  { %v792_v5 = vsub.f32 %v686_v12, %v2835_v45 }
 0x1a1   :  { %v793_v57 = vand.u32 4294901760, %v792_v5 }
 0x1a3   :  { %v794_v11 = vsub.f32 %v792_v5, %v793_v57 }
 0x1a5   :  { %v795_v10 = vand.u32 4294901760, %v794_v11 }
 0x1a7   :  { %1816 = vmatmul.mubr.f32.vlgmr.msra.gmra.mrb[0].mxu1 %v795_v10 }
 0x1a8   :  { %2163 = vmatpush3.bf16.msra.mxu1 %v2766_v42  ;;  %1850 = vmatprep.mubr.msk.f32.mxu1 %vm2332_vm0, %v2333_v8  ;;  %v2234_v42 = vpack.c.bf16 %v811_v32, %v804_v29 }
 0x1a9   :  { %2164 = vmatprep.subr.bf16.mxu1 %v2331_v3 }
 0x1ac   :  { %2166 = vmatpush3.bf16.msra.mxu1 %v2165_v17  ;;  %v2237_v17 = vpack.c.bf16 %v825_v9, %v818_v7 }
 0x1ad   :  { %2167 = vmatprep.subr.bf16.mxu1 %v2331_v3 }
 0x1b0   :  { %2169 = vmatpush3.bf16.msra.mxu1 %v2168_v24 }
 0x1b1   :  { %2170 = vmatprep.subr.bf16.mxu1 %v2331_v3 }
 0x1b4   :  { %2172 = vmatpush3.bf16.msra.mxu1 %v2171_v26 }
 0x1b5   :  { %2173 = vmatprep.subr.bf16.mxu1 %v2331_v3 }
 0x1b8   :  { %2175 = vmatpush3.bf16.msra.mxu1 %v2174_v2 }
 0x1b9   :  { %2176 = vmatprep.subr.bf16.mxu1 %v2331_v3 }
 0x1bc   :  { %2178 = vmatpush3.bf16.msra.mxu1 %v2177_v33 }
 0x1bd   :  { %2179 = vmatprep.subr.bf16.mxu1 %v2331_v3 }
 0x1c0   :  { %2181 = vmatpush3.bf16.msra.mxu1 %v2180_v50 }
 0x1c1   :  { %2182 = vmatprep.subr.bf16.mxu1 %v2331_v3 }
 0x1c4   :  { %2184 = vmatpush3.bf16.msra.mxu1 %v2183_v31 }
 0x1c5   :  { %2185 = vmatprep.subr.bf16.mxu1 %v2331_v3 }
 0x1c7   :  { %1851 = vmatmul.mubr.f32.vlgmr.msra.gmra.mrb[0].mxu1 %v2835_v45 }
 0x1c8   :  { %2187 = vmatpush3.bf16.msra.mxu1 %v2186_v55  ;;  %1885 = vmatprep.mubr.msk.f32.mxu1 %vm2332_vm0, %v2333_v8 }
 0x1c9   :  { %2188 = vmatprep.subr.bf16.mxu1 %v2331_v3 }
 0x1cc   :  { %2190 = vmatpush3.bf16.msra.mxu1 %v2189_v58 }
 0x1cd   :  { %2191 = vmatprep.subr.bf16.mxu1 %v2331_v3 }
 0x1d0   :  { %2193 = vmatpush3.bf16.msra.mxu1 %v2192_v28 }
 0x1d1   :  { %2194 = vmatprep.subr.bf16.mxu1 %v2331_v3 }
 0x1d4   :  { %2196 = vmatpush3.bf16.msra.mxu1 %v2195_v37 }
 0x1d5   :  { %2197 = vmatprep.subr.bf16.mxu1 %v2331_v3 }
 0x1d8   :  { %2199 = vmatpush3.bf16.msra.mxu1 %v2198_v39 }
 0x1d9   :  { %2200 = vmatprep.subr.bf16.mxu1 %v2331_v3 }
 0x1dc   :  { %2202 = vmatpush3.bf16.msra.mxu1 %v2201_v6 }
 0x1dd   :  { %2203 = vmatprep.subr.bf16.mxu1 %v2331_v3 }
 0x1e0   :  { %2205 = vmatpush3.bf16.msra.mxu1 %v2204_v30 }
 0x1e1   :  { %2206 = vmatprep.subr.bf16.mxu1 %v2331_v3 }
 0x1e4   :  { %2208 = vmatpush3.bf16.msra.mxu1 %v2207_v40 }
 0x1e5   :  { %2209 = vmatprep.subr.bf16.mxu1 %v2331_v3 }
 0x1e7   :  { %1886 = vmatmul.mubr.f32.vlgmr.msra.gmra.mrb[0].mxu1 %v792_v5 }
 0x1e8   :  { %2211 = vmatpush3.bf16.msra.mxu1 %v2588_v16  ;;  %1920 = vmatprep.mubr.msk.f32.mxu1 %vm2332_vm0, %v2333_v8 }
 0x1e9   :  { %2212 = vmatprep.subr.bf16.mxu1 %v2331_v3 }
 0x1ec   :  { %2214 = vmatpush3.bf16.msra.mxu1 %v2601_v53 }
 0x1ed   :  { %2215 = vmatprep.subr.bf16.mxu1 %v2331_v3 }
 0x1f0   :  { %2217 = vmatpush3.bf16.msra.mxu1 %v2623_v4 }
 0x1f1   :  { %2218 = vmatprep.subr.bf16.mxu1 %v2331_v3 }
 0x1f4   :  { %2220 = vmatpush3.bf16.msra.mxu1 %v2630_v25 }
 0x1f5   :  { %2221 = vmatprep.subr.bf16.mxu1 %v2331_v3 }
 0x1f8   :  { %2223 = vmatpush3.bf16.msra.mxu1 %v2637_v51 }
 0x1f9   :  { %2224 = vmatprep.subr.bf16.mxu1 %v2331_v3 }
 0x1fc   :  { %2226 = vmatpush3.bf16.msra.mxu1 %v2714_v38 }
 0x1fd   :  { %2227 = vmatprep.subr.bf16.mxu1 %v2331_v3 }
 0x200   :  { %2229 = vmatpush3.bf16.msra.mxu1 %v2724_v59 }
 0x201   :  { %2230 = vmatprep.subr.bf16.mxu1 %v2331_v3 }
 0x204   :  { %2232 = vmatpush3.bf16.msra.mxu1 %v2744_v34 }
 0x205   :  { %2233 = vmatprep.subr.bf16.mxu1 %v2331_v3 }
 0x207   :  { %1921 = vmatmul.mubr.f32.vlgmr.msra.gmra.mrb[0].mxu1 %v793_v57 }
 0x208   :  { %2235 = vmatpush3.bf16.msra.mxu1 %v2234_v42  ;;  %1955 = vmatprep.mubr.msk.f32.mxu1 %vm2332_vm0, %v2333_v8 }
 0x209   :  { %2236 = vmatprep.subr.bf16.mxu1 %v2331_v3 }
 0x20c   :  { %2238 = vmatpush3.bf16.msra.mxu1 %v2237_v17 }
 0x20d   :  { %2239 = vmatprep.subr.bf16.mxu1 %v2331_v3 }
 0x210   :  { %2241 = vmatpush3.bf16.msra.mxu1 %v2240_v46 }
 0x211   :  { %2242 = vmatprep.subr.bf16.mxu1 %v2331_v3 }
 0x214   :  { %2244 = vmatpush3.bf16.msra.mxu1 %v2243_v47 }
 0x215   :  { %2245 = vmatprep.subr.bf16.mxu1 %v2331_v3 }
 0x218   :  { %2247 = vmatpush3.bf16.msra.mxu1 %v2246_v48 }
 0x219   :  { %2248 = vmatprep.subr.bf16.mxu1 %v2331_v3 }
 0x21c   :  { %2250 = vmatpush3.bf16.msra.mxu1 %v2249_v56 }
 0x21d   :  { %2251 = vmatprep.subr.bf16.mxu1 %v2331_v3 }
 0x220   :  { %2253 = vmatpush3.bf16.msra.mxu1 %v2252_v43 }
 0x221   :  { %2254 = vmatprep.subr.bf16.mxu1 %v2331_v3 }
 0x224   :  { %2256 = vmatpush3.bf16.msra.mxu1 %v2255_v23 }
 0x225   :  { %2257 = vmatprep.subr.bf16.mxu1 %v2331_v3 }
 0x227   :  { %1956 = vmatmul.mubr.f32.vlgmr.msra.gmra.mrb[0].mxu1 %v2835_v45 }
 0x228   :  { %2259 = vmatpush3.bf16.msra.mxu1 %v2588_v16  ;;  %1990 = vmatprep.mubr.msk.f32.mxu1 %vm2332_vm0, %v2333_v8  ;;  %v1368_v8 = vld [vmem:[%s2957_s3] ss:$0 sm:$0xff] }
 0x229   :  { %2260 = vmatprep.subr.bf16.mxu1 %v2331_v3 }
 0x22c   :  { %2262 = vmatpush3.bf16.msra.mxu1 %v2601_v53 }
 0x22d   :  { %2263 = vmatprep.subr.bf16.mxu1 %v2331_v3 }
 0x230   :  { %2265 = vmatpush3.bf16.msra.mxu1 %v2623_v4 }
 0x231   :  { %2266 = vmatprep.subr.bf16.mxu1 %v2331_v3 }
 0x234   :  { %2268 = vmatpush3.bf16.msra.mxu1 %v2630_v25 }
 0x235   :  { %2269 = vmatprep.subr.bf16.mxu1 %v2331_v3 }
 0x238   :  { %2271 = vmatpush3.bf16.msra.mxu1 %v2637_v51 }
 0x239   :  { %2272 = vmatprep.subr.bf16.mxu1 %v2331_v3 }
 0x23c   :  { %2274 = vmatpush3.bf16.msra.mxu1 %v2714_v38 }
 0x23d   :  { %2275 = vmatprep.subr.bf16.mxu1 %v2331_v3 }
 0x240   :  { %2277 = vmatpush3.bf16.msra.mxu1 %v2724_v59 }
 0x241   :  { %2278 = vmatprep.subr.bf16.mxu1 %v2331_v3 }
 0x244   :  { %2280 = vmatpush3.bf16.msra.mxu1 %v2744_v34 }
 0x247   :  { %1991 = vmatmul.mubr.f32.vlgmr.msra.gmra.mrb[0].mxu1 %v2835_v45 }
 0x31a   :  { %v1347_v16 = vpop.f32.mrb[0].mxu1 }
 0x31b   :  { %v2282_v53 = vadd.f32 %v1368_v8, %v1347_v16  ;;  %v1992_v4 = vpop.f32.mrb[1].mxu1 }
 0x31d   :  { %1352 = vst.msk [vmem:[#allocation2] sm:$0xff] %vm1351_vm1, %v2282_v53 }
 0x31e   :  { %2318 = shalt.err (!%p2315_p4)
}
 0x31f   :  { %s2319_s12 = scalar_lea.hbm %s2959_s5, 128 }
 0x320   :  { %p2320_p5 = scmp.ne.s32.totalorder %s2959_s5, %s2319_s12  ;;  %p2323_p6 = scmp.lt.u32.totalorder %s2319_s12, %s2959_s5 }
 0x322   :  { %p2325_p7 = pnand %p2323_p6, %p2320_p5 }
 0x324   :  { %2328 = shalt.err (!%p2325_p7)
}
 0x325   :  { %1362 = dma.vmem_to_hbm [thread:$0]  %s1360_s8, 128, %s2959_s5, [#allocation3]  }
 0x326   :  { %2329 = dma.done.wait [#allocation3], 128  }
 0x327   :  { %2330 = vsyncadd [#allocation3], 4294967168 }
 0x328   :  { %1366 = vsyncpa [#allocation3], 1 }

</bundles_post_ra>
